<compile_context>
chip_gen: v6e
topology: v6e:2x2x1
jax: 0.10.0
libtpu: 0.0.40
codegen_flags: <defaults>
</compile_context>

<pallas_src>
import functools

import jax
import jax.numpy as jnp
from jax.experimental import pallas as pl
from jax.experimental.pallas import tpu as pltpu


def _round_up(v, m):
    return ((v + m - 1) // m) * m


def _add_place_kernel(x_ref, wcat_ref, bcat_ref, wa_ref, ba_ref,
                      ge_ref, logit_ref, prob_ref,
                      *, n_nodes, tile_n, ghp, mask_rows):
    i = pl.program_id(0)

    @pl.when(i == 0)
    def _init():
        ge_ref[...] = jnp.zeros_like(ge_ref)

    # Single wide MXU matmul fusing node_gating + node_to_graph:
    #   y[:, :2H]  = x @ Wn   (node_to_graph; columns [2H, GHP) are zero pad)
    #   y[:, GHP]  = x @ Wg   (node_gating logit; rest of last block is zero)
    x = x_ref[...]                                             # [TN, H] (f32/bf16)
    y = jnp.dot(x, wcat_ref[...], preferred_element_type=jnp.float32)
    y = y + bcat_ref[...]                                      # f32 elementwise

    ntg = y[:, :ghp]                                           # [TN, GHP]
    gate = jax.nn.sigmoid(y[:, ghp:ghp + 1])                   # [TN, 1]

    if mask_rows:
        # Host zero-pads x to a multiple of TN; zero out padded-row gates so
        # their (finite) ntg = bn contribution is dropped from the sum.
        row = i * tile_n + jax.lax.broadcasted_iota(jnp.int32, (tile_n, 1), 0)
        gate = jnp.where(row < n_nodes, gate, 0.0)

    # Node reduction on the MXU: gate^T @ ntg -> [1, GHP]  (no XLU axis-0 sum).
    ge_ref[...] += jax.lax.dot_general(
        gate, ntg, (((0,), (0,)), ((), ())),
        preferred_element_type=jnp.float32)

    @pl.when(i == pl.num_programs(0) - 1)
    def _finalize():
        ge = ge_ref[...]                                       # [1, GHP]
        # add_place: Linear(2H, 1) on the accumulated graph embedding.
        logit = jnp.sum(ge * wa_ref[...], axis=1, keepdims=True) + ba_ref[0]
        logit_ref[...] = logit
        prob_ref[...] = jax.nn.sigmoid(logit)


def add_place_forward(node_embeddings, params, *, tile_n=256,
                      compute_dtype=jnp.float32, vmem_limit_bytes=None):
    """Fused AddPlaceAgent forward ('full' graph_embedding_type).

    node_embeddings: [N, H] float32
    params: wg [H,1], bg [1,1], wn [H,2H], bn [1,2H], wa [2H,1], ba [1,1]
    compute_dtype: dtype of the MXU operands (x and fused weight); keep the
        accumulation and all elementwise math in f32 (jnp.bfloat16 recommended
        on v5e/v6e/v7x for bandwidth; f32 matches the torch module exactly).
    returns (graph_embedding [1,2H], logit [1,1], probability [1,1])
    """
    n, h = node_embeddings.shape
    gh = 2 * h
    ghp = _round_up(gh, 128)      # lane-dense node_to_graph / ge width
    wcat_w = ghp + 128            # extra 128-lane block carries the gating col

    # ---- host-side parameter packing (pre-pack once per model in production) --
    wcat = jnp.zeros((h, wcat_w), jnp.float32)
    wcat = wcat.at[:, :gh].set(params["wn"]).at[:, ghp].set(params["wg"][:, 0])
    bcat = jnp.zeros((1, wcat_w), jnp.float32)
    bcat = bcat.at[:, :gh].set(params["bn"]).at[:, ghp].set(params["bg"][:, 0])
    wa_row = jnp.zeros((1, ghp), jnp.float32)
    wa_row = wa_row.at[:, :gh].set(params["wa"][:, 0][None, :])
    ba_s = jnp.reshape(params["ba"], (1,)).astype(jnp.float32)

    # bf16 only on the MXU operands; bias/gate/ge math stays f32.
    x = node_embeddings.astype(compute_dtype)
    wcat = wcat.astype(compute_dtype)

    # ---- tile the node axis ----
    tn = min(tile_n, _round_up(n, 8))
    n_pad = _round_up(n, tn)
    if n_pad != n:
        x = jnp.pad(x, ((0, n_pad - n), (0, 0)))
    grid = (n_pad // tn,)

    kernel = functools.partial(
        _add_place_kernel, n_nodes=n, tile_n=tn, ghp=ghp,
        mask_rows=(n_pad != n))

    out_shapes = (
        jax.ShapeDtypeStruct((1, ghp), jnp.float32),   # padded graph embedding
        jax.ShapeDtypeStruct((1, 1), jnp.float32),     # logit
        jax.ShapeDtypeStruct((1, 1), jnp.float32),     # probability
    )

    ge_pad, logit, prob = pl.pallas_call(
        kernel,
        out_shape=out_shapes,
        grid=grid,
        in_specs=[
            pl.BlockSpec((tn, h), lambda i: (i, 0)),            # x tile (pipelined)
            pl.BlockSpec((h, wcat_w), lambda i: (0, 0)),        # fused Wn|Wg (resident)
            pl.BlockSpec((1, wcat_w), lambda i: (0, 0)),        # fused bn|bg
            pl.BlockSpec((1, ghp), lambda i: (0, 0)),           # add_place weight row
            pl.BlockSpec(memory_space=pltpu.MemorySpace.SMEM),  # add_place bias scalar
        ],
        out_specs=(
            pl.BlockSpec((1, ghp), lambda i: (0, 0)),
            pl.BlockSpec((1, 1), lambda i: (0, 0)),
            pl.BlockSpec((1, 1), lambda i: (0, 0)),
        ),
        compiler_params=pltpu.CompilerParams(
            dimension_semantics=("arbitrary",),   # reduction axis over node tiles
            vmem_limit_bytes=vmem_limit_bytes),
    )(x, wcat, bcat, wa_row, ba_s)

    return ge_pad[:, :gh], logit, prob


def bernoulli_action_log_prob(logit, action):
    """log p(action) under Bernoulli(logit); host-side glue (python `if`)."""
    if action == 0:
        return jax.nn.log_sigmoid(-logit)
    return jax.nn.log_sigmoid(logit)


def init_params(key, node_hidden_size):
    """Deterministic parameter init (PyTorch Linear-style uniform bounds)."""
    h = node_hidden_size
    gh = 2 * h
    ks = jax.random.split(key, 6)

    def lin(kw, kb, fan_in, fan_out):
        bound = 1.0 / jnp.sqrt(fan_in)
        w = jax.random.uniform(kw, (fan_in, fan_out), jnp.float32, -bound, bound)
        b = jax.random.uniform(kb, (1, fan_out), jnp.float32, -bound, bound)
        return w, b

    wg, bg = lin(ks[0], ks[1], h, 1)     # node_gating Linear(H, 1)
    wn, bn = lin(ks[2], ks[3], h, gh)    # node_to_graph Linear(H, 2H)
    wa, ba = lin(ks[4], ks[5], gh, 1)    # add_place Linear(2H, 1)
    return {"wg": wg, "bg": bg, "wn": wn, "bn": bn, "wa": wa, "ba": ba}


def _reference(x, params):
    gate = jax.nn.sigmoid(x @ params["wg"] + params["bg"])
    ntg = x @ params["wn"] + params["bn"]
    ge = jnp.sum(gate * ntg, axis=0, keepdims=True)
    logit = ge @ params["wa"] + params["ba"]
    return ge, logit, jax.nn.sigmoid(logit)


if __name__ == "__main__":
    key = jax.random.PRNGKey(0)
    k_x1, k_x2, k_p = jax.random.split(key, 3)

    H = 32
    params = init_params(k_p, H)

    # --- small graph (single grid step), f32 MXU path ---
    x1 = jax.random.normal(k_x1, (8, H), dtype=jnp.float32)
    ge1, logit1, prob1 = add_place_forward(x1, params)
    jax.block_until_ready((ge1, logit1, prob1))
    ge1_r, logit1_r, prob1_r = _reference(x1, params)
    assert jnp.allclose(ge1, ge1_r, atol=1e-4, rtol=1e-4)
    assert jnp.allclose(logit1, logit1_r, atol=1e-4, rtol=1e-4)
    assert jnp.allclose(prob1, prob1_r, atol=1e-4, rtol=1e-4)

    # --- larger graph exercising the node-tiled grid + row masking ---
    x2 = jax.random.normal(k_x2, (300, H), dtype=jnp.float32)
    ge2, logit2, prob2 = add_place_forward(x2, params, tile_n=128)
    jax.block_until_ready((ge2, logit2, prob2))
    ge2_r, logit2_r, prob2_r = _reference(x2, params)
    assert jnp.allclose(ge2, ge2_r, atol=1e-3, rtol=1e-3)
    assert jnp.allclose(logit2, logit2_r, atol=1e-3, rtol=1e-3)
    assert jnp.allclose(prob2, prob2_r, atol=1e-3, rtol=1e-3)

    # --- bf16 MXU operands (bandwidth/throughput path for v5e/v6e/v7x) ---
    ge3, logit3, prob3 = add_place_forward(
        x1, params, compute_dtype=jnp.bfloat16)
    jax.block_until_ready((ge3, logit3, prob3))
    assert jnp.allclose(ge3, ge1_r, atol=5e-2, rtol=5e-2)
    assert jnp.allclose(logit3, logit1_r, atol=5e-2, rtol=5e-2)
    assert jnp.allclose(prob3, prob1_r, atol=5e-2, rtol=5e-2)

    # Module-level glue (inference semantics): decide action from probability.
    p = float(jnp.clip(prob1[0, 0], 0.0, 1.0))
    action = int(p > 0.5)
    add_place = bool(action == 1)
    log_prob = bernoulli_action_log_prob(logit1, action)
    jax.block_until_ready(log_prob)
    assert isinstance(add_place, bool)

    print("KERNEL_OK")
</pallas_src>

<mosaic_0001>
module attributes {stable_mosaic.version = 11 : i64} {
  func.func @_add_place_kernel(%arg0: i32, %arg1: memref<8x32xf32, #tpu.memory_space<vmem>>, %arg2: memref<32x256xf32, #tpu.memory_space<vmem>>, %arg3: memref<1x256xf32, #tpu.memory_space<vmem>>, %arg4: memref<1x128xf32, #tpu.memory_space<vmem>>, %arg5: memref<1xf32, #tpu.memory_space<smem>>, %arg6: memref<1x128xf32, #tpu.memory_space<vmem>>, %arg7: memref<1x1xf32, #tpu.memory_space<vmem>>, %arg8: memref<1x1xf32, #tpu.memory_space<vmem>>) attributes {dimension_semantics = [#tpu.dimension_semantics<arbitrary>], iteration_bounds = array<i64: 1>, scalar_prefetch = 0 : i64, scratch_operands = 0 : i64, tpu.core_type = #tpu.core_type<tc>, window_params = [{transform_indices = @transform_0, window_bounds = array<i64: 8, 32>}, {pipeline_mode = #tpu.pipeline_mode<synchronous>, transform_indices = @transform_1, window_bounds = array<i64: 32, 256>}, {pipeline_mode = #tpu.pipeline_mode<synchronous>, transform_indices = @transform_2, window_bounds = array<i64: 1, 256>}, {pipeline_mode = #tpu.pipeline_mode<synchronous>, transform_indices = @transform_3, window_bounds = array<i64: 1, 128>}, {transform_indices = @transform_4, window_bounds = array<i64: 1>}, {pipeline_mode = #tpu.pipeline_mode<synchronous>, transform_indices = @transform_5, window_bounds = array<i64: 1, 128>}, {pipeline_mode = #tpu.pipeline_mode<synchronous>, transform_indices = @transform_6, window_bounds = array<i64: 1, 1>}, {pipeline_mode = #tpu.pipeline_mode<synchronous>, transform_indices = @transform_7, window_bounds = array<i64: 1, 1>}]} {
    %c0_i32 = arith.constant 0 : i32
    %0 = arith.cmpi eq, %arg0, %c0_i32 : i32
    %1 = arith.extui %0 : i1 to i32
    %c0_i32_0 = arith.constant 0 : i32
    %2 = arith.cmpi ne, %1, %c0_i32_0 : i32
    scf.if %2 {
      %cst_14 = arith.constant 0.000000e+00 : f32
      %23 = vector.broadcast %cst_14 : f32 to vector<1x128xf32>
      %c0_15 = arith.constant 0 : index
      %c0_16 = arith.constant 0 : index
      %24 = vector.load %arg6[%c0_15, %c0_16] : memref<1x128xf32, #tpu.memory_space<vmem>>, vector<1x128xf32>
      tpu.vector_store %arg6[%c0_15, %c0_16], %23 {strides = array<i32>} : memref<1x128xf32, #tpu.memory_space<vmem>>, vector<1x128xf32>,
    } else {
    }
    %c0 = arith.constant 0 : index
    %c0_1 = arith.constant 0 : index
    %3 = vector.load %arg1[%c0, %c0_1] : memref<8x32xf32, #tpu.memory_space<vmem>>, vector<8x32xf32>
    %c0_2 = arith.constant 0 : index
    %c0_3 = arith.constant 0 : index
    %4 = vector.load %arg2[%c0_2, %c0_3] : memref<32x256xf32, #tpu.memory_space<vmem>>, vector<32x256xf32>
    %cst = arith.constant dense<0.000000e+00> : vector<8x256xf32>
    %5 = tpu.matmul %3, %4, %cst {dimension_numbers = #tpu.dot_dimension_numbers<[1], [0], [0], [1], [0, 0, 1, 1], [], []>} : vector<8x32xf32>, vector<32x256xf32>, vector<8x256xf32> -> vector<8x256xf32>
    %c0_4 = arith.constant 0 : index
    %c0_5 = arith.constant 0 : index
    %6 = vector.load %arg3[%c0_4, %c0_5] : memref<1x256xf32, #tpu.memory_space<vmem>>, vector<1x256xf32>
    %7 = vector.broadcast %6 : vector<1x256xf32> to vector<8x256xf32>
    %8 = arith.addf %5, %7 : vector<8x256xf32>
    %9 = vector.extract_strided_slice %8 {offsets = [0, 0], sizes = [8, 128], strides = [1, 1]} : vector<8x256xf32> to vector<8x128xf32>
    %10 = vector.extract_strided_slice %8 {offsets = [0, 128], sizes = [8, 1], strides = [1, 1]} : vector<8x256xf32> to vector<8x1xf32>
    %11 = arith.negf %10 : vector<8x1xf32>
    %12 = math.exp %11 : vector<8x1xf32>
    %cst_6 = arith.constant 1.000000e+00 : f32
    %13 = vector.broadcast %cst_6 : f32 to vector<8x1xf32>
    %14 = arith.addf %13, %12 : vector<8x1xf32>
    %15 = arith.divf %13, %14 : vector<8x1xf32>
    %c0_7 = arith.constant 0 : index
    %c0_8 = arith.constant 0 : index
    %16 = vector.load %arg6[%c0_7, %c0_8] : memref<1x128xf32, #tpu.memory_space<vmem>>, vector<1x128xf32>
    %cst_9 = arith.constant dense<0.000000e+00> : vector<1x128xf32>
    %17 = tpu.matmul %15, %9, %cst_9 {dimension_numbers = #tpu.dot_dimension_numbers<[0], [0], [1], [1], [0, 1, 1, 1], [], []>} : vector<8x1xf32>, vector<8x128xf32>, vector<1x128xf32> -> vector<1x128xf32>
    %18 = arith.addf %16, %17 : vector<1x128xf32>
    %c0_10 = arith.constant 0 : index
    %c0_11 = arith.constant 0 : index
    %19 = vector.load %arg6[%c0_10, %c0_11] : memref<1x128xf32, #tpu.memory_space<vmem>>, vector<1x128xf32>
    tpu.vector_store %arg6[%c0_10, %c0_11], %18 {strides = array<i32>} : memref<1x128xf32, #tpu.memory_space<vmem>>, vector<1x128xf32>,
    %c0_i32_12 = arith.constant 0 : i32
    %20 = arith.cmpi eq, %arg0, %c0_i32_12 : i32
    %21 = arith.extui %20 : i1 to i32
    %c0_i32_13 = arith.constant 0 : i32
    %22 = arith.cmpi ne, %21, %c0_i32_13 : i32
    scf.if %22 {
      %c0_14 = arith.constant 0 : index
      %c0_15 = arith.constant 0 : index
      %23 = vector.load %arg6[%c0_14, %c0_15] : memref<1x128xf32, #tpu.memory_space<vmem>>, vector<1x128xf32>
      %c0_16 = arith.constant 0 : index
      %c0_17 = arith.constant 0 : index
      %24 = vector.load %arg4[%c0_16, %c0_17] : memref<1x128xf32, #tpu.memory_space<vmem>>, vector<1x128xf32>
      %25 = arith.mulf %23, %24 : vector<1x128xf32>
      %cst_18 = arith.constant dense<0.000000e+00> : vector<1xf32>
      %26 = vector.multi_reduction <add>, %25, %cst_18 [1] : vector<1x128xf32> to vector<1xf32>
      %27 = vector.shape_cast %26 : vector<1xf32> to vector<1x1xf32>
      %c0_19 = arith.constant 0 : index
      %28 = memref.load %arg5[%c0_19] : memref<1xf32, #tpu.memory_space<smem>>
      %29 = vector.broadcast %28 : f32 to vector<1x1xf32>
      %30 = arith.addf %27, %29 : vector<1x1xf32>
      %c0_20 = arith.constant 0 : index
      %c0_21 = arith.constant 0 : index
      %31 = vector.load %arg7[%c0_20, %c0_21] : memref<1x1xf32, #tpu.memory_space<vmem>>, vector<1x1xf32>
      tpu.vector_store %arg7[%c0_20, %c0_21], %30 {strides = array<i32>} : memref<1x1xf32, #tpu.memory_space<vmem>>, vector<1x1xf32>,
      %32 = arith.negf %30 : vector<1x1xf32>
      %33 = math.exp %32 : vector<1x1xf32>
      %cst_22 = arith.constant 1.000000e+00 : f32
      %34 = vector.broadcast %cst_22 : f32 to vector<1x1xf32>
      %35 = arith.addf %34, %33 : vector<1x1xf32>
      %36 = arith.divf %34, %35 : vector<1x1xf32>
      %c0_23 = arith.constant 0 : index
      %c0_24 = arith.constant 0 : index
      %37 = vector.load %arg8[%c0_23, %c0_24] : memref<1x1xf32, #tpu.memory_space<vmem>>, vector<1x1xf32>
      tpu.vector_store %arg8[%c0_23, %c0_24], %36 {strides = array<i32>} : memref<1x1xf32, #tpu.memory_space<vmem>>, vector<1x1xf32>,
    } else {
    }
    return
  }
  func.func @transform_0(%arg0: i32) -> (i32, i32) {
    %c0_i32 = arith.constant 0 : i32
    %c0_i32_0 = arith.constant 0 : i32
    return %arg0, %c0_i32 : i32, i32
  }
  func.func @transform_1(%arg0: i32) -> (i32, i32) {
    %c0_i32 = arith.constant 0 : i32
    %c0_i32_0 = arith.constant 0 : i32
    %c0_i32_1 = arith.constant 0 : i32
    return %c0_i32, %c0_i32_0 : i32, i32
  }
  func.func @transform_2(%arg0: i32) -> (i32, i32) {
    %c0_i32 = arith.constant 0 : i32
    %c0_i32_0 = arith.constant 0 : i32
    %c0_i32_1 = arith.constant 0 : i32
    return %c0_i32, %c0_i32_0 : i32, i32
  }
  func.func @transform_3(%arg0: i32) -> (i32, i32) {
    %c0_i32 = arith.constant 0 : i32
    %c0_i32_0 = arith.constant 0 : i32
    %c0_i32_1 = arith.constant 0 : i32
    return %c0_i32, %c0_i32_0 : i32, i32
  }
  func.func @transform_4(%arg0: i32) -> i32 {
    %c0_i32 = arith.constant 0 : i32
    %c0_i32_0 = arith.constant 0 : i32
    return %c0_i32 : i32
  }
  func.func @transform_5(%arg0: i32) -> (i32, i32) {
    %c0_i32 = arith.constant 0 : i32
    %c0_i32_0 = arith.constant 0 : i32
    %c0_i32_1 = arith.constant 0 : i32
    return %c0_i32, %c0_i32_0 : i32, i32
  }
  func.func @transform_6(%arg0: i32) -> (i32, i32) {
    %c0_i32 = arith.constant 0 : i32
    %c0_i32_0 = arith.constant 0 : i32
    %c0_i32_1 = arith.constant 0 : i32
    return %c0_i32, %c0_i32_0 : i32, i32
  }
  func.func @transform_7(%arg0: i32) -> (i32, i32) {
    %c0_i32 = arith.constant 0 : i32
    %c0_i32_0 = arith.constant 0 : i32
    %c0_i32_1 = arith.constant 0 : i32
    return %c0_i32, %c0_i32_0 : i32, i32
  }
}

</mosaic_0001>

<bundles_post_ra>
// kernel: tpu_custom_call.1
= control target key start
LH: loop header
LB: loop body
LE: loop exit
PB: predicated region body
PF: predicated region fallthrough
CT: control target
= control target key end

     0   :  { %14 = vsyncpa [#allocation4], 0  ;;  %s544_s0 = inlined_call_operand.hbm [shape: f32[8,32], index: 0, kind: input, shape index: {}]   ;;  %s545_s1 = inlined_call_operand.hbm [shape: f32[32,256], index: 1, kind: input, shape index: {}]   ;;  %s546_s2 = inlined_call_operand.vmem [shape: f32[1,256], index: 2, kind: input, shape index: {}]   ;;  %s547_s3 = inlined_call_operand.vmem [shape: f32[1,128], index: 3, kind: input, shape index: {}]   ;;  %s548_s4 = inlined_call_operand.<no memory space> [shape: f32[1], index: 4, kind: input, shape index: {}]   ;;  %s549_s5 = inlined_call_operand.hbm [shape: f32[1,128], index: 5, kind: output, shape index: {0}]   ;;  %s550_s6 = inlined_call_operand.hbm [shape: f32[1,1], index: 6, kind: output, shape index: {1}]   ;;  %s551_s7 = inlined_call_operand.hbm [shape: f32[1,1], index: 7, kind: output, shape index: {2}]  }
   0x1   :  { %15 = vsyncpa [#allocation7], 0 }
   0x2   :  { %16 = vsyncpa [#allocation5], 0 }
   0x3   :  { %17 = vsyncpa [#allocation10], 0  ;;  %s469_s24 = smov [#allocation3]   ;;  %s470_s26 = smov [#allocation6]  }
   0x4   :  { %s24_s25 = sshll.u32 %s469_s24, 4  ;;  %s33_s27 = sshll.u32 %s470_s26, 4  ;;  %s25_s25 = int_to_ptr.vmem [resolvable:$true] %s24_s25  ;;  %s34_s27 = int_to_ptr.vmem [resolvable:$true] %s33_s27 }
   0x5   :  { %s369_s28 = scalar_lea.vmem %s25_s25, 128  ;;  %p374_p1 = scmp.lt.s32.totalorder %s25_s25, %s25_s25 }
   0x6   :  { %p370_p0 = scmp.ne.s32.totalorder %s25_s25, %s369_s28  ;;  %p375_p2 = scmp.lt.s32.totalorder %s369_s28, %s369_s28 }
   0x8   :  { %p376_p3 = por %p375_p2, %p374_p1 }
   0xa   :  { %p377_p4 = pnand %p376_p3, %p370_p0 }
   0xc   :  { %380 = shalt.err (!%p377_p4)
}
   0xd   :  { %27 = dma.hbm_to_vmem [thread:$0]  %s544_s0, 128, %s25_s25, [#allocation4]  }
   0xe   :  { %s389_s8 = scalar_lea.vmem %s34_s27, 1024  ;;  %p394_p6 = scmp.lt.s32.totalorder %s34_s27, %s34_s27 }
   0xf   :  { %p390_p5 = scmp.ne.s32.totalorder %s34_s27, %s389_s8  ;;  %p395_p7 = scmp.lt.s32.totalorder %s389_s8, %s389_s8 }
  0x11   :  { %p396_p8 = por %p395_p7, %p394_p6 }
  0x13   :  { %p397_p9 = pnand %p396_p8, %p390_p5 }
  0x15   :  { %400 = shalt.err (!%p397_p9)
}
  0x16   :  { %s471_s9 = smov 256   ;;  %s472_s10 = smov 16  }
  0x17   :  { %39 = dma.hbm_to_vmem [thread:$0]  %s545_s1, 1024, %s34_s27, [#allocation7], %s471_s9, %s471_s9, %s472_s10  }
  0x18   :  { %461 = dma.done.wait [#allocation4], 128  }
  0x19   :  { %462 = vsyncadd [#allocation4], 4294967168 }
  0x1a   :  { %463 = dma.done.wait [#allocation7], 1024  }
  0x1b   :  { %464 = vsyncadd [#allocation7], 4294966272  ;;  %v473_v0 = vmov 0.0   ;;  %v65_v1 = vld [vmem:[#allocation6 + $0x38] sm:$0xff]  ;;  %v64_v2 = vld [vmem:[#allocation6 + $0x30] sm:$0xff]  ;;  %vm78_vm0 = vcmask 261120   ;;  %v68_v10 = vlaneseq }
  0x1c   :  { %56 = vst [vmem:[#allocation8] sm:$0x1] %v473_v0  ;;  %146 = vmatprep.mubr.f32.mxu0 %v473_v0  ;;  %339 = vmatprep.subr.mxu1 %v473_v0  ;;  %v63_v3 = vld [vmem:[#allocation6 + $0x28] sm:$0xff]  ;;  %v62_v4 = vld [vmem:[#allocation6 + $0x20] sm:$0xff]  ;;  %v61_v5 = vld [vmem:[#allocation6 + $0x18] sm:$0xff]  ;;  %vm474_vm1 = vmmov 0  }
  0x1d   :  { %106 = vmatprep.subr.mxu0 %v65_v1  ;;  %v60_v6 = vld [vmem:[#allocation6 + $0x10] sm:$0xff]  ;;  %v59_v7 = vld [vmem:[#allocation6 + $0x8] sm:$0xff]  ;;  %v58_v8 = vld [vmem:[#allocation6] sm:$0xff]  ;;  %341 = vmatprep.mubr.msk.f32.mxu1 %vm474_vm1, %v473_v0  ;;  %v69_v11 = vshrl.u32 %v68_v10, 7  ;;  %vm192_vm2 = vcmask 64512   ;;  %vm274_vm3 = vcmask 1040384  }
  0x1e   :  { %107 = vmatpush1.msra.mxu0 %v64_v2  ;;  %v57_v9 = vld [vmem:[#allocation3] sm:$0xff]  ;;  %s475_s14 = smov [#allocation8]  }
  0x1f   :  { %108 = vmatprep.subr.mxu0 %v63_v3  ;;  %v70_v12 = vsub.s32 0, %v69_v11  ;;  %v66_v13 = vld [vmem:[%s546_s2] sm:$0x3]  ;;  %v74_v14 = vsub.s32 1, %v69_v11  ;;  %s296_s15 = sshll.u32 %s475_s14, 4  ;;  %s297_s15 = int_to_ptr.vmem [resolvable:$true] %s296_s15 }
  0x20   :  { %109 = vmatpush1.msra.mxu0 %v62_v4  ;;  %v272_v30 = vld [vmem:[%s547_s3] sm:$0x1]  ;;  %s401_s16 = scalar_lea.vmem %s297_s15, 16  ;;  %s405_s17 = scalar_lea.vmem %s297_s15, 32 }
  0x21   :  { %110 = vmatprep.subr.mxu0 %v61_v5  ;;  %v71_v15 = vrot.slane %v66_v13, %v70_v12  ;;  %v75_v16 = vrot.slane %v66_v13, %v74_v14  ;;  %p402_p10 = scmp.ne.s32.totalorder %s297_s15, %s401_s16  ;;  %p406_p11 = scmp.lt.s32.totalorder %s297_s15, %s297_s15 }
  0x22   :  { %111 = vmatpush1.msra.mxu0 %v60_v6  ;;  %p407_p12 = scmp.lt.s32.totalorder %s405_s17, %s401_s16 }
  0x23   :  { %112 = vmatprep.subr.mxu0 %v59_v7  ;;  %v159_v26 = vld [vmem:[#allocation8] sm:$0x1] }
  0x24   :  { %113 = vmatpush1.msra.mxu0 %v58_v8  ;;  %p408_p13 = por %p407_p12, %p406_p11 }
  0x25   :  { %333 = vmatmul.mubr.msk.f32.vlgmr.msra.gmra.mxu0 %vm78_vm0, %v57_v9 }
  0x26   :  { %p409_p0 = pnand %p408_p13, %p402_p10 }
  0xe5   :  { %v148_v17 = vpop.f32.mrf.mxu0 }
  0xe6   :  { %v149_v18 = vadd.f32 %v148_v17, %v71_v15 }
  0xe7   :  { %v150_v19 = vpop.f32.mrf.mxu0 }
  0xe8   :  { %v151_v20 = vadd.f32 %v150_v19, %v75_v16  ;;  %340 = vmatpush3.msra.mxu1 %v149_v18 }
  0xea   :  { %v334_v21 = vmul.f32 -1.442695, %v151_v20 }
  0xec   :  { %353 = vpow2.f32 %v334_v21 }
  0xf9   :  { %v354_v22 = vpop.eup %353 }
  0xfa   :  { %v156_v23 = vadd.f32 1.0, %v354_v22 }
  0xfc   :  { %355 = vrcp.f32 %v156_v23 }
 0x109   :  { %v356_v24 = vpop.eup %355 }
 0x10a   :  { %160 = vxpose.xlu0.b32.start.end [1/1] (short) (narrow) %v356_v24, 8 }
 0x186   :  { %v176_v25 = vpop.trf.xlu0 }
 0x187   :  { %342 = vmatmul.mubr.msk.f32.vlgmr.msra.gmra.mxu1 %vm192_vm2, %v176_v25 }
 0x247   :  { %v262_v27 = vpop.f32.mrf.mxu1 }
 0x248   :  { %v266_v28 = vadd.f32 %v262_v27, %v159_v26 }
 0x249   :  { %v343_v29 = vpop.f32.mrf.mxu1 }
 0x24a   :  { %267 = vst [vmem:[#allocation8] sm:$0x1] %v266_v28 }
 0x251   :  { %v271_v31 = vld [vmem:[#allocation8] sm:$0x1] }
 0x252   :  { %v273_v32 = vmul.f32 %v272_v30, %v271_v31 }
 0x254   :  { %v275_v33 = vsel %vm274_vm3, %v273_v32, 0.0 }
 0x255   :  { %276 = vadd.xlane.f32.xlu0 %v275_v33 }
 0x256   :  { %412 = shalt.err (!%p409_p0)
}
 0x257   :  { %299 = dma.vmem_to_hbm [thread:$0]  %s297_s15, 16, %s549_s5, [#allocation5]   ;;  %v279_v34 = vstv %s548_s4  ;;  %vm281_vm4 = vcmask 0  }
 0x258   :  { %s476_s21 = smov [#allocation9]  }
 0x259   :  { %s306_s22 = sshll.u32 %s476_s21, 4  ;;  %s307_s22 = int_to_ptr.vmem [resolvable:$true] %s306_s22 }
 0x25a   :  { %s421_s23 = scalar_lea.vmem %s307_s22, 16  ;;  %s425_s24 = scalar_lea.vmem %s307_s22, 32 }
 0x25b   :  { %p422_p1 = scmp.ne.s32.totalorder %s307_s22, %s421_s23  ;;  %p426_p2 = scmp.lt.s32.totalorder %s307_s22, %s307_s22 }
 0x25c   :  { %p427_p3 = scmp.lt.s32.totalorder %s425_s24, %s421_s23 }
 0x25e   :  { %p428_p4 = por %p427_p3, %p426_p2 }
 0x260   :  { %p429_p5 = pnand %p428_p4, %p422_p1 }
 0x2de   :  { %v277_v35 = vpop.xlane.xlu0 %276 }
 0x2df   :  { %v280_v36 = vadd.f32 %v279_v34, %v277_v35 }
 0x2e1   :  { %v336_v37 = vmul.f32 -1.442695, %v280_v36  ;;  %282 = vst.msk [vmem:[#allocation9] sm:$0x1] %vm281_vm4, %v280_v36 }
 0x2e2   :  { %432 = shalt.err (!%p429_p5)
}
 0x2e3   :  { %309 = dma.vmem_to_hbm [thread:$0]  %s307_s22, 16, %s550_s6, [#allocation10]   ;;  %357 = vpow2.f32 %v336_v37 }
 0x2e4   :  { %s477_s4 = smov [#allocation11]  }
 0x2e5   :  { %s316_s26 = sshll.u32 %s477_s4, 4  ;;  %s317_s26 = int_to_ptr.vmem [resolvable:$true] %s316_s26 }
 0x2e6   :  { %s441_s27 = scalar_lea.vmem %s317_s26, 16  ;;  %s445_s28 = scalar_lea.vmem %s317_s26, 32 }
 0x2e7   :  { %p442_p6 = scmp.ne.s32.totalorder %s317_s26, %s441_s27  ;;  %p446_p7 = scmp.lt.s32.totalorder %s317_s26, %s317_s26 }
 0x2e8   :  { %p447_p8 = scmp.lt.s32.totalorder %s445_s28, %s441_s27 }
 0x2ea   :  { %p448_p9 = por %p447_p8, %p446_p7 }
 0x2ec   :  { %p449_p10 = pnand %p448_p9, %p442_p6 }
 0x2f0   :  { %v358_v38 = vpop.eup %357 }
 0x2f1   :  { %v286_v39 = vadd.f32 1.0, %v358_v38 }
 0x2f3   :  { %359 = vrcp.f32 %v286_v39 }
 0x300   :  { %v360_v40 = vpop.eup %359 }
 0x301   :  { %289 = vst.msk [vmem:[#allocation11] sm:$0x1] %vm281_vm4, %v360_v40 }
 0x302   :  { %452 = shalt.err (!%p449_p10)
}
 0x303   :  { %319 = dma.vmem_to_hbm [thread:$0]  %s317_s26, 16, %s551_s7, [#allocation10]  }
 0x304   :  { %465 = dma.done.wait [#allocation5], 16  }
 0x305   :  { %466 = vsyncadd [#allocation5], 4294967280 }
 0x306   :  { %467 = dma.done.wait [#allocation10], 32  }
 0x307   :  { %468 = vsyncadd [#allocation10], 4294967264 }
 0x308   :  { %329 = vsyncpa [#allocation4], 1 }
 0x309   :  { %330 = vsyncpa [#allocation7], 1 }
 0x30a   :  { %331 = vsyncpa [#allocation5], 1 }
 0x30b   :  { %332 = vsyncpa [#allocation10], 1 }

</bundles_post_ra>
